<compile_context>
chip_gen: v6e
topology: v6e:2x2x1
jax: 0.10.0
libtpu: 0.0.40
codegen_flags: <defaults>
</compile_context>

<pallas_src>
import jax
import jax.numpy as jnp
from jax.experimental import pallas as pl
from jax.experimental.pallas import tpu as pltpu


def _make_quality_kernel(kc, nkk):
    def kernel(x_ref, w_ref, q_ref):
        # x_ref : (rb, kc)     K-chunk k of frame j for rb clips (lane-dense)
        # w_ref : (rb, K_pad)  folded weight row, resident (constant block index)
        # q_ref : (rb, 128)    f32 logit of frame j, replicated across lanes
        k = pl.program_id(2)

        @pl.when(k == 0)
        def _init():
            q_ref[...] = jnp.zeros_like(q_ref)

        x = x_ref[...].astype(jnp.float32)            # bf16 producers upcast in-kernel
        if nkk == 1:
            w = w_ref[...]
        else:
            off = pl.multiple_of(k * kc, 128)
            w = w_ref[:, pl.ds(off, kc)]              # aligned slice of resident row
        partial = jnp.sum(x * w, axis=-1, keepdims=True)       # (rb, 1) lane reduce (XLU)
        q_ref[...] += jnp.broadcast_to(partial, q_ref.shape)   # lane-dense accumulate

    return kernel


def _plan(b, t, K, x_dtype):
    """Batch blocking + K chunking with real VMEM residency accounting."""
    itemsize = jnp.dtype(x_dtype).itemsize
    sub = 8 * max(1, 4 // itemsize)          # sublane packing: 8 rows f32, 16 rows bf16

    # Batch blocking: >=2 "parallel" batch blocks whenever that does not inflate
    # per-core HBM traffic (b > sub).  For b <= sub a single full-dim block is both
    # legal and traffic-optimal; megacore parallelism then comes from the (also
    # "parallel") time axis instead of padded zero rows.
    if b <= sub:
        rb, b_pad = b, b
    else:
        rb = sub
        b_pad = sub * (-(-b // sub))          # nb >= 2, padded rows are sliced off
    nb = b_pad // rb
    rows_phys = (-(-rb // sub)) * sub         # physical sublane rows of one x buffer
    w_rows_phys = (-(-rb // 8)) * 8           # physical rows of the f32 weight buffer

    # Per-generation VMEM limit (explicit, per review).  Fallback is conservative.
    try:
        cap = pltpu.get_tpu_info().vmem_capacity_bytes
    except Exception:
        cap = 64 << 20
    vmem_limit = (48 << 20) if cap <= (64 << 20) else (64 << 20)   # v7x vs v5e/v6e
    budget = (vmem_limit * 3) // 4

    # Real residency: 2x double-buffered x tile + 2x resident w + out buffers + margin.
    w_resident = 2 * w_rows_phys * K * 4
    out_resident = 2 * w_rows_phys * 128 * 4
    avail_x = budget - w_resident - out_resident - (2 << 20)
    per_lane = 2 * rows_phys * itemsize       # double-buffered x bytes per lane column
    assert avail_x >= per_lane * 128, (
        "folded weight row too large to keep resident in VMEM for this budget")
    kc_cap = min(avail_x // per_lane, (16 << 20) // (rows_phys * itemsize))
    kc_cap = max(128, (kc_cap // 128) * 128)

    if K <= kc_cap:
        kc, K_pad = K, K
    else:
        best = 128
        c = kc_cap
        while c >= 128:                        # largest multiple-of-128 divisor <= cap
            if K % c == 0:
                best = c
                break
            c -= 128
        if 2 * best >= kc_cap:                 # near-budget divisor: no data copy
            kc, K_pad = best, K
        else:                                  # pathological K: zero-pad host-side so
            kc = kc_cap                        # the chunk stays near the VMEM budget
            K_pad = kc * (-(-K // kc))
    nkk = K_pad // kc
    return rb, b_pad, nb, kc, K_pad, nkk, vmem_limit


def reference_select_block(x_nchw, params, b, t):
    """x_nchw: (b*t, C, H, W). Returns (b,) int32 argmax-over-t frame indices."""
    N, C, H, W = x_nchw.shape
    assert N == b * t
    HW = H * W
    K = C * HW
    assert K % 128 == 0, "C*H*W must be a multiple of 128 for the lane-dense layout"

    rb, b_pad, nb, kc, K_pad, nkk, vmem_limit = _plan(b, t, K, x_nchw.dtype)

    # Metadata reshape in the common (unpadded) case; zero-pad only when required.
    x3 = x_nchw.reshape(b, t, K)
    if K_pad != K:
        x3 = jnp.pad(x3, ((0, 0), (0, 0), (0, K_pad - K)))
    if b_pad != b:
        x3 = jnp.pad(x3, ((0, b_pad - b), (0, 0), (0, 0)))
    x_flat = x3.reshape(b_pad, t * K_pad)          # keep source dtype (f32 / bf16)

    # Fold avg-pool (1/HW), the conv 3x3 center tap (exact on a 1x1 zero-padded map)
    # and the BN scale a = gamma/sqrt(var+eps) (sign included) into one weight row.
    # Sigmoid and the additive constant (conv bias + BN shift) are monotone/constant
    # across frames, so dropping them leaves the argmax unchanged.
    eps = 1e-5
    a = params["bn_gamma"][0] / jnp.sqrt(params["bn_var"][0] + eps)
    w_center = params["conv_w"][0, :, 1, 1]                        # (C,)
    w_row = jnp.broadcast_to((w_center * (a / HW))[:, None], (C, HW)).reshape(K)
    if K_pad != K:
        w_row = jnp.pad(w_row, (0, K_pad - K))
    w_rep = jnp.tile(w_row[None, :], (rb, 1)).astype(jnp.float32)  # (rb, K_pad)

    grid = (nb, t, nkk)   # K innermost -> fully sequential x HBM streaming; the
                          # resident w block index is constant -> fetched once.
    itemsize = jnp.dtype(x_nchw.dtype).itemsize
    cost = pl.CostEstimate(
        flops=2 * b_pad * t * K_pad,
        transcendentals=0,
        bytes_accessed=b_pad * t * K_pad * itemsize
        + rb * K_pad * 4
        + b_pad * t * 128 * 4,
    )

    q = pl.pallas_call(
        _make_quality_kernel(kc, nkk),
        out_shape=jax.ShapeDtypeStruct((b_pad, t * 128), jnp.float32),
        grid_spec=pltpu.PrefetchScalarGridSpec(
            num_scalar_prefetch=0,
            grid=grid,
            in_specs=[
                pl.BlockSpec((rb, kc), lambda i, j, k: (i, j * nkk + k)),  # x stream
                pl.BlockSpec((rb, K_pad), lambda i, j, k: (0, 0)),         # resident w
            ],
            out_specs=pl.BlockSpec((rb, 128), lambda i, j, k: (i, j)),     # lane-dense
        ),
        compiler_params=pltpu.CompilerParams(
            dimension_semantics=("parallel", "parallel", "arbitrary"),
            vmem_limit_bytes=vmem_limit,
        ),
        cost_estimate=cost,
    )(x_flat, w_rep)

    logits = q.reshape(b_pad, t, 128)[:b, :, 0]        # (b, t) per-frame quality logits
    # TODO(synk): PyTorch argmax returns int64; JAX/TPU-native int32 kept here.
    return jnp.argmax(logits, axis=1).astype(jnp.int32)


def _reference_jax(x_nchw, params, b, t):
    """Pure-JAX reference with the FULL padded 3x3 conv + BN + sigmoid, for validation."""
    eps = 1e-5
    pooled = jnp.mean(x_nchw, axis=(2, 3), keepdims=True)            # (N, C, 1, 1)
    conv = jax.lax.conv_general_dilated(
        pooled, params["conv_w"], window_strides=(1, 1),
        padding=((1, 1), (1, 1)),
        dimension_numbers=("NCHW", "OIHW", "NCHW"))                  # (N, 1, 1, 1)
    conv = conv + params["conv_b"].reshape(1, 1, 1, 1)
    bn = (params["bn_gamma"].reshape(1, 1, 1, 1)
          * (conv - params["bn_mean"].reshape(1, 1, 1, 1))
          / jnp.sqrt(params["bn_var"].reshape(1, 1, 1, 1) + eps)
          + params["bn_beta"].reshape(1, 1, 1, 1))
    quality = jax.nn.sigmoid(bn).reshape(b, t)
    return jnp.argmax(quality, axis=1).astype(jnp.int32)


if __name__ == "__main__":
    b, t, feat_dim, H, W = 2, 4, 4, 16, 16
    N = b * t

    key = jax.random.PRNGKey(0)
    k_x, k_w, k_b = jax.random.split(key, 3)

    x = jax.random.normal(k_x, (N, feat_dim, H, W), dtype=jnp.float32)

    # Deterministic synthetic parameters (shapes from Conv2d(feat_dim,1,3,3)+BN(1)).
    params = {
        "conv_w": 0.1 * jax.random.normal(k_w, (1, feat_dim, 3, 3), dtype=jnp.float32),
        "conv_b": 0.05 * jax.random.normal(k_b, (1,), dtype=jnp.float32),
        "bn_gamma": jnp.array([0.9], jnp.float32),
        "bn_beta": jnp.array([0.1], jnp.float32),
        "bn_mean": jnp.array([0.05], jnp.float32),
        "bn_var": jnp.array([1.2], jnp.float32),
    }

    idx = reference_select_block(x, params, b, t)
    idx = jax.block_until_ready(idx)

    idx_ref = _reference_jax(x, params, b, t)
    assert idx.shape == (b,)
    assert bool(jnp.all(idx == idx_ref)), (idx, idx_ref)

    print("KERNEL_OK")
</pallas_src>

<mosaic_0001>
module attributes {stable_mosaic.version = 11 : i64} {
  func.func @kernel(%arg0: i32, %arg1: i32, %arg2: i32, %arg3: memref<2x1024xf32, #tpu.memory_space<vmem>>, %arg4: memref<2x1024xf32, #tpu.memory_space<vmem>>, %arg5: memref<2x128xf32, #tpu.memory_space<vmem>>) attributes {dimension_semantics = [#tpu.dimension_semantics<parallel>, #tpu.dimension_semantics<parallel>, #tpu.dimension_semantics<arbitrary>], iteration_bounds = array<i64: 1, 4, 1>, scalar_prefetch = 0 : i64, scratch_operands = 0 : i64, tpu.core_type = #tpu.core_type<tc>, window_params = [{transform_indices = @transform_0, window_bounds = array<i64: 2, 1024>}, {pipeline_mode = #tpu.pipeline_mode<synchronous>, transform_indices = @transform_1, window_bounds = array<i64: 2, 1024>}, {transform_indices = @transform_2, window_bounds = array<i64: 2, 128>}]} {
    %c0_i32 = arith.constant 0 : i32
    %0 = arith.cmpi eq, %arg2, %c0_i32 : i32
    %1 = arith.extui %0 : i1 to i32
    %c0_i32_0 = arith.constant 0 : i32
    %2 = arith.cmpi ne, %1, %c0_i32_0 : i32
    scf.if %2 {
      %cst_8 = arith.constant 0.000000e+00 : f32
      %13 = vector.broadcast %cst_8 : f32 to vector<2x128xf32>
      %c0_9 = arith.constant 0 : index
      %c0_10 = arith.constant 0 : index
      %14 = vector.load %arg5[%c0_9, %c0_10] : memref<2x128xf32, #tpu.memory_space<vmem>>, vector<2x128xf32>
      tpu.vector_store %arg5[%c0_9, %c0_10], %13 {strides = array<i32>} : memref<2x128xf32, #tpu.memory_space<vmem>>, vector<2x128xf32>,
    } else {
    }
    %c0 = arith.constant 0 : index
    %c0_1 = arith.constant 0 : index
    %3 = vector.load %arg3[%c0, %c0_1] : memref<2x1024xf32, #tpu.memory_space<vmem>>, vector<2x1024xf32>
    %c0_2 = arith.constant 0 : index
    %c0_3 = arith.constant 0 : index
    %4 = vector.load %arg4[%c0_2, %c0_3] : memref<2x1024xf32, #tpu.memory_space<vmem>>, vector<2x1024xf32>
    %5 = arith.mulf %3, %4 : vector<2x1024xf32>
    %cst = arith.constant dense<0.000000e+00> : vector<2xf32>
    %6 = vector.multi_reduction <add>, %5, %cst [1] : vector<2x1024xf32> to vector<2xf32>
    %7 = vector.shape_cast %6 : vector<2xf32> to vector<2x1xf32>
    %c0_4 = arith.constant 0 : index
    %c0_5 = arith.constant 0 : index
    %8 = vector.load %arg5[%c0_4, %c0_5] : memref<2x128xf32, #tpu.memory_space<vmem>>, vector<2x128xf32>
    %9 = vector.shape_cast %7 : vector<2x1xf32> to vector<2x1xf32>
    %10 = vector.broadcast %9 : vector<2x1xf32> to vector<2x128xf32>
    %11 = arith.addf %8, %10 : vector<2x128xf32>
    %c0_6 = arith.constant 0 : index
    %c0_7 = arith.constant 0 : index
    %12 = vector.load %arg5[%c0_6, %c0_7] : memref<2x128xf32, #tpu.memory_space<vmem>>, vector<2x128xf32>
    tpu.vector_store %arg5[%c0_6, %c0_7], %11 {strides = array<i32>} : memref<2x128xf32, #tpu.memory_space<vmem>>, vector<2x128xf32>,
    return
  }
  func.func @transform_0(%arg0: i32, %arg1: i32, %arg2: i32) -> (i32, i32) {
    %c1_i32 = arith.constant 1 : i32
    %0 = arith.muli %arg1, %c1_i32 : i32
    %1 = arith.addi %0, %arg2 : i32
    %c0_i32 = arith.constant 0 : i32
    return %arg0, %1 : i32, i32
  }
  func.func @transform_1(%arg0: i32, %arg1: i32, %arg2: i32) -> (i32, i32) {
    %c0_i32 = arith.constant 0 : i32
    %c0_i32_0 = arith.constant 0 : i32
    %c0_i32_1 = arith.constant 0 : i32
    return %c0_i32, %c0_i32_0 : i32, i32
  }
  func.func @transform_2(%arg0: i32, %arg1: i32, %arg2: i32) -> (i32, i32) {
    %c0_i32 = arith.constant 0 : i32
    return %arg0, %arg1 : i32, i32
  }
}

</mosaic_0001>

<bundles_post_ra>
// kernel: tpu_custom_call.1
= control target key start
LH: loop header
LB: loop body
LE: loop exit
PB: predicated region body
PF: predicated region fallthrough
CT: control target
= control target key end

     0   :  { %7 = vsyncpa [#allocation3], 0  ;;  %s818_s0 = inlined_call_operand.hbm [shape: f32[2,4096], index: 0, kind: input, shape index: {}]   ;;  %s819_s1 = inlined_call_operand.hbm [shape: f32[2,1024], index: 1, kind: input, shape index: {}]   ;;  %s820_s2 = inlined_call_operand.hbm [shape: f32[2,512], index: 2, kind: output, shape index: {}]  }
   0x1   :  { %9 = vsyncpa [#allocation3 + $0x1], 0 }
   0x2   :  { %10 = vsyncpa [#allocation6], 0 }
   0x3   :  { %11 = vsyncpa [#allocation4], 0 }
   0x4   :  { %13 = vsyncpa [#allocation4 + $0x1], 0  ;;  %s644_s9 = smov 0   ;;  %s646_s10 = smov 0  }
   0x5   :  { %s648_s11 = smov 0   ;;  %s650_s12 = smov 0  }
   0x6   :  { %s652_s13 = smov 0   ;;  %s654_s14 = smov 0  }
   0x7 LB: > { %s392_s15 = sadd.s32 4294967295, %s622_s14   ;;  %s393_s16 = sadd.s32 4294967294, %s622_s14   ;;  %s622_s14 = sphi %s654_s14, %s19_s14   ;;  %s618_s13 = sphi %s652_s13, %s836_s13   ;;  %s614_s12 = sphi %s650_s12, %s835_s12   ;;  %s610_s11 = sphi %s648_s11, %s834_s11   ;;  %s606_s10 = sphi %s646_s10, %s833_s10   ;;  %s602_s9 = sphi %s644_s9, %s832_s9  }
   0x8   : > { %p62_p0 = scmp.ne.s32.totalorder %s606_s10, %s602_s9  ;;  %p678_p1 = scmp.eq.s32.totalorder %s392_s15, 0 }
   0x9   : > { %p682_p2 = scmp.eq.s32.totalorder %s392_s15, 3  ;;  %p115_p3 = scmp.eq.s32.totalorder %s393_s16, 3 }
   0xa   : > { %p688_p4 = por %p678_p1, %p62_p0  ;;  %p394_p5 = scmp.ge.s32.totalorder %s622_s14, 1 }
   0xb   : > { %p693_p6 = por %p115_p3, %p62_p0  ;;  %p122_p7 = scmp.lt.s32.totalorder %s622_s14, 5 }
   0xc   : > { %s824_s19 = scalar_select %p688_p4, 1, 0 }
   0xd   : > { %s825_s20 = scalar_select %p693_p6, 1, 0 }
   0xe   : > { %p698_p8 = pnand %p394_p5, %p122_p7  ;;  %s624_s22 = smov [#allocation5]  }
   0xf   : > { %s135_s23 = sshll.u32 %s624_s22, 4  ;;  %s34_s25 = sadd.s32 1, %s618_s13  ;;  %s136_s23 = int_to_ptr.vmem [resolvable:$true] %s135_s23 }
  0x10   : > { %p417_p9 = pneg %p698_p8  ;;  %s49_s26 = sadd.s32 1, %s610_s11 }
  0x11   : > { %p36_p11 = scmp.ge.s32.totalorder %s34_s25, 4  ;;  %s495_s27 = scalar_lea.vmem %s136_s23, 256 }
  0x12   : > { %p706_p10 = pnand %p417_p9, %p678_p1  ;;  %p496_p13 = scmp.ne.s32.totalorder %s136_s23, %s495_s27 }
  0x13   : > { %p503_p5 = scmp.lt.s32.totalorder %s136_s23, %s136_s23  ;;  %p504_p7 = scmp.lt.s32.totalorder %s495_s27, %s495_s27 }
  0x14   : > { %p486_p12 = pneg %p706_p10 }
  0x15   : > { %p505_p6 = por %p504_p7, %p503_p5 }
  0x16   : > { %p498_p0 = pnand %p496_p13, %p486_p12 }
  0x18   : > { %p499_p3 = pneg %p498_p0 }
  0x1a   : > { %p506_p4 = pnand %p505_p6, %p499_p3 }
  0x1c   : > { %509 = shalt.err (!%p506_p4)
}
  0x1d   : > { %420 = dma.hbm_to_vmem [thread:$0]  (!%p706_p10), %s819_s1, 256, %s136_s23, [#allocation6]  }
  0x1e   : > { %s838_s25 = smov (%p36_p11, %s34_s25), 0  ;;  %p56_p6 = scmp.ne.s32.totalorder %s610_s11, %s606_s10 }
  0x1f   : > { %p57_p4 = scmp.eq.s32.totalorder %s622_s14, 0  ;;  %s45_s30 = ssub.s32 %s618_s13, %s838_s25 }
  0x20   : > { %p430_p9 = scmp.lt.s32.totalorder %s622_s14, 4  ;;  %p47_p12 = scmp.eq.s32.totalorder %s45_s30, 0 }
  0x21   : > { %p58_p13 = por %p57_p4, %p56_p6  ;;  %p729_p0 = por %p682_p2, %p56_p6 }
  0x22   : > { %s146_s4 = sand.u32 1, %s610_s11   ;;  %s408_s7 = sshll.u32 %s618_s13, 8 }
  0x23   : > { %s735_s5 = scalar_select %p47_p12, %s610_s11, %s49_s26  }
  0x24   : > { %s397_s6 = sshll.u32 %s146_s4, 4  ;;  %s159_s16 = scalar_lea.hbm %s818_s0, %s408_s7 }
  0x25   : > { %s150_s22 = scalar_lea.vmem [#allocation2], %s397_s6  ;;  %p741_p10 = pnand %p430_p9, %p58_p13 }
  0x26   : > { %s161_s23 = sshll.u32 %s150_s22, 4  ;;  %s147_s18 = scalar_lea.sflag [#allocation3], %s146_s4  ;;  %s162_s23 = int_to_ptr.vmem [resolvable:$true] %s161_s23 }
  0x27   : > { %p512_p2 = pneg %p741_p10  ;;  %s523_s27 = scalar_lea.vmem %s162_s23, 256 }
  0x28   : > { %p524_p11 = scmp.ne.s32.totalorder %s162_s23, %s523_s27  ;;  %s625_s26 = smov [#allocation2]  }
  0x29   : > { %s528_s28 = sshll.u32 %s625_s26, 4  ;;  %s529_s28 = int_to_ptr.vmem [resolvable:$false] %s528_s28 }
  0x2a   : > { %p526_p3 = pnand %p524_p11, %p512_p2  ;;  %s530_s29 = scalar_lea.vmem %s529_s28, 512 }
  0x2b   : > { %p531_p7 = scmp.lt.s32.totalorder %s162_s23, %s529_s28  ;;  %p532_p6 = scmp.lt.s32.totalorder %s530_s29, %s523_s27 }
  0x2c   : > { %p527_p5 = pneg %p526_p3 }
  0x2d   : > { %p533_p4 = por %p532_p6, %p531_p7 }
  0x2f   : > { %p534_p12 = pnand %p533_p4, %p527_p5 }
  0x31   : > { %537 = shalt.err (!%p534_p12)
}
  0x32   : > { %424 = dma.hbm_to_vmem [thread:$0]  (!%p741_p10), %s159_s16, 256, %s162_s23, %s147_s18  }
  0x33   : > { %170 = sbr.rel (%p698_p8) target bundleno = 238 (0xee), region = 28  ;;  %s752_s30 = sand.u32 (!%p698_p8), 1, %s606_s10  }
  0x34   : > { %s401_s4 = sshll.u32 (!%p698_p8), %s752_s30, 4  ;;  %s173_s6 = scalar_lea.sflag (!%p698_p8), [#allocation3], %s752_s30 }
  0x35   : > { %s176_s7 = scalar_lea.vmem (!%p698_p8), [#allocation2], %s401_s4  ;;  %p830_p9 = scmp.ne.s32.totalorder (!%p698_p8), %s824_s19, 0 }
  0x38   : > { %589 = dma.done.wait (%p830_p9), %s173_s6, 256  }
  0x39   : > { %591 = vsyncadd (%p830_p9), %s173_s6, 4294967040 }
  0x3a   : > { %593 = dma.done.wait (%p678_p1), [#allocation6], 256  }
  0x3b   : > { %595 = vsyncadd (%p678_p1), [#allocation6], 4294967040  ;;  %v220_v0 = vlaneseq  ;;  %s403_s21 = sshll.u32 %s752_s30, 1  ;;  %v626_v1 = vmov 1983009808   ;;  %v627_v4 = vmov 0.0  }
  0x3c   : > { %v218_v2 = vunpack.c.l.s4 %v626_v1  ;;  %s765_s8 = scalar_lea.vmem [#allocation7], %s403_s21  ;;  %v208_v7 = vld [vmem:[%s176_s7] sm:$0xff]  ;;  %v209_v8 = vld [vmem:[%s176_s7 + $0x8] sm:$0xff]  ;;  %vm258_vm0 = vcmask 1041408   ;;  %s405_s17 = sshll.u32 %s614_s12, 5 }
  0x3d   : > { %v221_v3 = vshrl.u32 %v220_v0, 7  ;;  %207 = vst [vmem:[%s765_s8] sm:$0x3] %v627_v4  ;;  %v210_v9 = vld [vmem:[#allocation5] sm:$0xff]  ;;  %v211_v10 = vld [vmem:[#allocation5 + $0x8] sm:$0xff]  ;;  %s295_s19 = sshll.u32 %s765_s8, 4  ;;  %s293_s22 = scalar_lea.hbm %s820_s2, %s405_s17  ;;  %s296_s19 = int_to_ptr.vmem [resolvable:$true] %s295_s19 }
  0x3e   : > { %v219_v5 = vunpack.c.0.s8 %v218_v2  ;;  %v212_v11 = vmul.f32 %v210_v9, %v208_v7  ;;  %v213_v12 = vmul.f32 %v211_v10, %v209_v8  ;;  %s280_s23 = scalar_lea.sflag [#allocation4], %s752_s30  ;;  %s538_s24 = scalar_lea.vmem %s296_s19, 32 }
  0x3f   : > { %p539_p1 = scmp.ne.s32.totalorder %s296_s19, %s538_s24  ;;  %s628_s18 = smov [#allocation7]  }
  0x40   : > { %v222_v6 = vsub.s32 %v219_v5, %v221_v3  ;;  %v216_v13 = vcombine.high %v212_v11, %v212_v11  ;;  %v233_v15 = vcombine.high %v213_v12, %v213_v12  ;;  %s542_s27 = sshll.u32 %s628_s18, 4  ;;  %s543_s27 = int_to_ptr.vmem [resolvable:$false] %s542_s27 }
  0x41   : > { %p540_p8 = pnand %p539_p1, %p729_p0  ;;  %s544_s26 = scalar_lea.vmem %s543_s27, 64 }
  0x42   : > { %v223_v14 = vrot.slane %v212_v11, %v222_v6  ;;  %v230_v16 = vrot.slane %v216_v13, %v222_v6  ;;  %v240_v18 = vrot.slane %v213_v12, %v222_v6  ;;  %v247_v24 = vrot.slane %v233_v15, %v222_v6  ;;  %p545_p10 = scmp.lt.s32.totalorder %s296_s19, %s543_s27  ;;  %p546_p2 = scmp.lt.s32.totalorder %s544_s26, %s538_s24 }
  0x43   : > { %p541_p13 = pneg %p540_p8 }
  0x44   : > { %v231_v17 = vcombine.high %v223_v14, %v223_v14  ;;  %v259_v19 = vsel %vm258_vm0, %v223_v14, 0.0  ;;  %v232_v20 = vcombine.high %v230_v16, %v230_v16  ;;  %v262_v22 = vsel %vm258_vm0, %v230_v16, 0.0  ;;  %v276_v38 = vld [vmem:[%s765_s8] sm:$0x3]  ;;  %p547_p11 = por %p546_p2, %p545_p10 }
  0x45   : > { %v248_v25 = vcombine.high %v240_v18, %v240_v18  ;;  %v266_v28 = vsel %vm258_vm0, %v240_v18, 0.0  ;;  %v249_v30 = vcombine.high %v247_v24, %v247_v24  ;;  %v270_v33 = vsel %vm258_vm0, %v247_v24, 0.0 }
  0x46   : > { %v260_v21 = vsel %vm258_vm0, %v231_v17, 0.0  ;;  %v264_v26 = vsel %vm258_vm0, %v232_v20, 0.0  ;;  %p548_p3 = pnand %p547_p11, %p541_p13 }
  0x47   : > { %v261_v23 = vadd.f32 %v260_v21, %v259_v19  ;;  %v268_v31 = vsel %vm258_vm0, %v248_v25, 0.0  ;;  %v272_v35 = vsel %vm258_vm0, %v249_v30, 0.0 }
  0x49   : > { %v263_v27 = vadd.f32 %v262_v22, %v261_v23 }
  0x4b   : > { %v265_v29 = vadd.f32 %v264_v26, %v263_v27 }
  0x4d   : > { %v267_v32 = vadd.f32 %v266_v28, %v265_v29 }
  0x4f   : > { %v269_v34 = vadd.f32 %v268_v31, %v267_v32 }
  0x51   : > { %v271_v36 = vadd.f32 %v270_v33, %v269_v34 }
  0x53   : > { %v273_v37 = vadd.f32 %v272_v35, %v271_v36 }
  0x55   : > { %274 = vadd.xlane.f32.xlu0 %v273_v37 }
  0xde   : > { %v275_v39 = vpop.xlane.xlu0 %274 }
  0xdf   : > { %v277_v40 = vadd.f32 %v276_v38, %v275_v39 }
  0xe1   : > { %278 = vst [vmem:[%s765_s8] sm:$0x3] %v277_v40 }
  0xe2   : > { %551 = shalt.err (!%p548_p3)
}
  0xe3   : > { %s552_s12 = scalar_lea.hbm %s293_s22, 32  ;;  %s556_s30 = scalar_lea.hbm %s820_s2, 128 }
  0xe4   : > { %p553_p5 = scmp.ne.s32.totalorder %s293_s22, %s552_s12  ;;  %p557_p4 = scmp.lt.s32.totalorder %s293_s22, %s820_s2 }
  0xe5   : > { %p558_p12 = scmp.lt.s32.totalorder %s556_s30, %s552_s12 }
  0xe6   : > { %p554_p7 = pnand %p553_p5, %p729_p0 }
  0xe7   : > { %p559_p9 = por %p558_p12, %p557_p4 }
  0xe8   : > { %p555_p6 = pneg %p554_p7 }
  0xea   : > { %p560_p1 = pnand %p559_p9, %p555_p6 }
  0xec   : > { %563 = shalt.err (!%p560_p1)
}
  0xed   : > { %415 = dma.vmem_to_hbm [thread:$0]  (%p729_p0), %s296_s19, 32, %s293_s22, %s280_s23  }
  0xee PF: > { %p432_p8 = scmp.ge.s32.totalorder %s622_s14, 2  ;;  %s307_s7 = sand.u32 1, %s602_s9  }
  0xef   : > { %p831_p13 = scmp.ne.s32.totalorder %s825_s20, 0  ;;  %s308_s21 = scalar_lea.sflag [#allocation4], %s307_s7 }
  0xf1   : > { %p426_p10 = pnand %p432_p8, %p831_p13 }
  0xf3   : > { %p427_p2 = pneg %p426_p10 }
  0xf5   : > { %597 = dma.done.wait (%p427_p2), %s308_s21, 32  }
  0xf6   : > { %599 = vsyncadd (%p427_p2), %s308_s21, 4294967264  ;;  %s19_s14 = sadd.s32 1, %s622_s14   ;;  %s832_s9 = smov %s606_s10 }
  0xf7   : > { %p16_p11 = scmp.ge.s32.totalorder %s19_s14, 6   ;;  %s833_s10 = smov %s610_s11 }
  0xf8   : > { %s834_s11 = smov %s735_s5  ;;  %s835_s12 = smov %s618_s13 }
  0xf9   : > { %s836_s13 = smov %s838_s25  ;;  %18 = sbr.rel (!%p16_p11) target bundleno = 7 (0x7), region = 81 }
  0xfe   :  { %313 = vsyncpa [#allocation3], 1 }
  0xff   :  { %315 = vsyncpa [#allocation3 + $0x1], 1 }
 0x100   :  { %316 = vsyncpa [#allocation6], 1 }
 0x101   :  { %317 = vsyncpa [#allocation4], 1 }
 0x102   :  { %319 = vsyncpa [#allocation4 + $0x1], 1 }

</bundles_post_ra>
